<compile_context>
chip_gen: v7x
topology: tpu7x:2x2x1
jax: 0.10.0
libtpu: 0.0.40
codegen_flags: <defaults>
</compile_context>

<pallas_src>
import jax
import jax.numpy as jnp
from jax.experimental import pallas as pl
from jax.experimental.pallas import tpu as pltpu

IN_FEATURES = 28 * 28      # 784
IN_PAD = 896               # 7 * 128 (lane-clean K)
HIDDEN_DIM = 128
OUT_FEATURES = 10
OUT_PAD = 128              # lane-dense output width


def _round_up(x, m):
    return ((x + m - 1) // m) * m


def _mlp_kernel(x_ref, w1_ref, b1_ref, w2_ref, b2_ref, o_ref):
    # Layer 1: (TB, 896)bf16 @ (896, 128)bf16 -> f32 acc, bias + ReLU in f32.
    h = jnp.dot(x_ref[...], w1_ref[...], preferred_element_type=jnp.float32)
    h = jnp.maximum(h + b1_ref[...], 0.0)
    # Layer 2: (TB, 128)bf16 @ (128, 128)bf16 -> f32 acc, bias + ReLU in f32.
    y = jnp.dot(h.astype(jnp.bfloat16), w2_ref[...],
                preferred_element_type=jnp.float32)
    y = jnp.maximum(y + b2_ref[...], 0.0)
    o_ref[...] = y.astype(o_ref.dtype)


def backbone_forward(x_nchw, w1, b1, w2, b2, *, block_b=512):
    """x_nchw: (B, C, H, W) with C*H*W == 784. Returns (B, 10) float32."""
    B = x_nchw.shape[0]
    x = x_nchw.reshape(B, -1).astype(jnp.float32)      # torch: x.view(B, -1)
    assert x.shape[1] == IN_FEATURES, x.shape

    # --- pad K (784 -> 896) with zero columns / zero weight rows -------------
    x = jnp.pad(x, ((0, 0), (0, IN_PAD - IN_FEATURES)))
    w1p = jnp.pad(w1.astype(jnp.float32), ((0, IN_PAD - IN_FEATURES), (0, 0)))
    b1p = b1.astype(jnp.float32).reshape(1, HIDDEN_DIM)

    # --- pad output N (10 -> 128) with zero columns (lane-dense store) -------
    w2p = jnp.pad(w2.astype(jnp.float32), ((0, 0), (0, OUT_PAD - OUT_FEATURES)))
    b2p = jnp.pad(b2.astype(jnp.float32).reshape(1, OUT_FEATURES),
                  ((0, 0), (0, OUT_PAD - OUT_FEATURES)))

    # --- bf16 MXU operands (f32 accumulation inside the kernel) --------------
    x_bf = x.astype(jnp.bfloat16)
    w1_bf = w1p.astype(jnp.bfloat16)
    w2_bf = w2p.astype(jnp.bfloat16)

    # --- batch tiling: TB <= block_b, pad B up to a multiple of TB -----------
    tb = min(block_b, _round_up(B, 8))
    b_pad = _round_up(B, tb)
    if b_pad != B:
        x_bf = jnp.pad(x_bf, ((0, b_pad - B), (0, 0)))
    grid = (b_pad // tb,)

    cost = pl.CostEstimate(
        flops=2 * b_pad * (IN_PAD * HIDDEN_DIM + HIDDEN_DIM * OUT_PAD),
        transcendentals=0,
        bytes_accessed=(b_pad * IN_PAD * 2            # x (bf16)
                        + IN_PAD * HIDDEN_DIM * 2     # w1 (bf16)
                        + HIDDEN_DIM * OUT_PAD * 2    # w2 (bf16)
                        + b_pad * OUT_PAD * 4),       # out (f32)
    )

    out = pl.pallas_call(
        _mlp_kernel,
        out_shape=jax.ShapeDtypeStruct((b_pad, OUT_PAD), jnp.float32),
        grid=grid,
        in_specs=[
            pl.BlockSpec((tb, IN_PAD), lambda i: (i, 0)),            # x tile
            pl.BlockSpec((IN_PAD, HIDDEN_DIM), lambda i: (0, 0)),    # w1 resident
            pl.BlockSpec((1, HIDDEN_DIM), lambda i: (0, 0)),         # b1 resident
            pl.BlockSpec((HIDDEN_DIM, OUT_PAD), lambda i: (0, 0)),   # w2 resident
            pl.BlockSpec((1, OUT_PAD), lambda i: (0, 0)),            # b2 resident
        ],
        out_specs=pl.BlockSpec((tb, OUT_PAD), lambda i: (i, 0)),
        compiler_params=pltpu.CompilerParams(
            dimension_semantics=("parallel",),
        ),
        cost_estimate=cost,
    )(x_bf, w1_bf, b1p, w2_bf, b2p)

    # Drop padded batch rows and padded output columns outside the kernel.
    return out[:B, :OUT_FEATURES]


def init_params(key, hidden_dim=HIDDEN_DIM):
    """Deterministic synthetic init (matches torch.nn.Linear shapes, stored
    transposed as (in, out) for the kernel)."""
    k1, k2, k3, k4 = jax.random.split(key, 4)
    # torch default init is U(-1/sqrt(fan_in), 1/sqrt(fan_in)); mimic that.
    s1 = 1.0 / jnp.sqrt(IN_FEATURES)
    s2 = 1.0 / jnp.sqrt(hidden_dim)
    w1 = jax.random.uniform(k1, (IN_FEATURES, hidden_dim), jnp.float32, -s1, s1)
    b1 = jax.random.uniform(k2, (1, hidden_dim), jnp.float32, -s1, s1)
    w2 = jax.random.uniform(k3, (hidden_dim, OUT_FEATURES), jnp.float32, -s2, s2)
    b2 = jax.random.uniform(k4, (1, OUT_FEATURES), jnp.float32, -s2, s2)
    return w1, b1, w2, b2


def reference_forward(x_nchw, w1, b1, w2, b2):
    """Pure-JAX f32 reference matching the PyTorch forward."""
    B = x_nchw.shape[0]
    x = x_nchw.reshape(B, -1).astype(jnp.float32)
    h = jnp.maximum(x @ w1 + b1, 0.0)
    return jnp.maximum(h @ w2 + b2, 0.0)


if __name__ == "__main__":
    key = jax.random.PRNGKey(0)
    k_x, k_p = jax.random.split(key)

    w1, b1, w2, b2 = init_params(k_p)

    # Small batch; spatial dims fixed by the module (flatten must yield 784).
    x = jax.random.normal(k_x, (8, 1, 28, 28), dtype=jnp.float32)
    out = jax.block_until_ready(backbone_forward(x, w1, b1, w2, b2))
    ref = reference_forward(x, w1, b1, w2, b2)
    assert out.shape == (8, OUT_FEATURES), out.shape
    # bf16 MXU operands with f32 accumulation -> small deviation vs pure-f32 ref.
    assert jnp.allclose(out, ref, atol=5e-2, rtol=5e-2), "mismatch vs reference"

    # Batch not a multiple of the tile: exercises batch padding + row slicing.
    x2 = jax.random.normal(jax.random.fold_in(k_x, 1), (5, 1, 28, 28),
                           dtype=jnp.float32)
    out2 = jax.block_until_ready(backbone_forward(x2, w1, b1, w2, b2))
    ref2 = reference_forward(x2, w1, b1, w2, b2)
    assert out2.shape == (5, OUT_FEATURES), out2.shape
    assert jnp.allclose(out2, ref2, atol=5e-2, rtol=5e-2), "mismatch (padded batch)"

    print("KERNEL_OK")
</pallas_src>

<mosaic_0001>
module attributes {stable_mosaic.version = 11 : i64} {
  func.func @_mlp_kernel(%arg0: i32, %arg1: memref<8x896xbf16, #tpu.memory_space<vmem>>, %arg2: memref<896x128xbf16, #tpu.memory_space<vmem>>, %arg3: memref<1x128xf32, #tpu.memory_space<vmem>>, %arg4: memref<128x128xbf16, #tpu.memory_space<vmem>>, %arg5: memref<1x128xf32, #tpu.memory_space<vmem>>, %arg6: memref<8x128xf32, #tpu.memory_space<vmem>>) attributes {dimension_semantics = [#tpu.dimension_semantics<parallel>], iteration_bounds = array<i64: 1>, scalar_prefetch = 0 : i64, scratch_operands = 0 : i64, tpu.core_type = #tpu.core_type<tc>, window_params = [{transform_indices = @transform_0, window_bounds = array<i64: 8, 896>}, {pipeline_mode = #tpu.pipeline_mode<synchronous>, transform_indices = @transform_1, window_bounds = array<i64: 896, 128>}, {pipeline_mode = #tpu.pipeline_mode<synchronous>, transform_indices = @transform_2, window_bounds = array<i64: 1, 128>}, {pipeline_mode = #tpu.pipeline_mode<synchronous>, transform_indices = @transform_3, window_bounds = array<i64: 128, 128>}, {pipeline_mode = #tpu.pipeline_mode<synchronous>, transform_indices = @transform_4, window_bounds = array<i64: 1, 128>}, {transform_indices = @transform_5, window_bounds = array<i64: 8, 128>}]} {
    %c0 = arith.constant 0 : index
    %c0_0 = arith.constant 0 : index
    %0 = vector.load %arg1[%c0, %c0_0] : memref<8x896xbf16, #tpu.memory_space<vmem>>, vector<8x896xbf16>
    %c0_1 = arith.constant 0 : index
    %c0_2 = arith.constant 0 : index
    %1 = vector.load %arg2[%c0_1, %c0_2] : memref<896x128xbf16, #tpu.memory_space<vmem>>, vector<896x128xbf16>
    %cst = arith.constant dense<0.000000e+00> : vector<8x128xf32>
    %2 = tpu.matmul %0, %1, %cst {dimension_numbers = #tpu.dot_dimension_numbers<[1], [0], [0], [1], [0, 0, 1, 1], [], []>} : vector<8x896xbf16>, vector<896x128xbf16>, vector<8x128xf32> -> vector<8x128xf32>
    %c0_3 = arith.constant 0 : index
    %c0_4 = arith.constant 0 : index
    %3 = vector.load %arg3[%c0_3, %c0_4] : memref<1x128xf32, #tpu.memory_space<vmem>>, vector<1x128xf32>
    %4 = vector.broadcast %3 : vector<1x128xf32> to vector<8x128xf32>
    %5 = arith.addf %2, %4 : vector<8x128xf32>
    %cst_5 = arith.constant 0.000000e+00 : f32
    %6 = vector.broadcast %cst_5 : f32 to vector<8x128xf32>
    %7 = arith.maximumf %5, %6 : vector<8x128xf32>
    %8 = arith.truncf %7 : vector<8x128xf32> to vector<8x128xbf16>
    %c0_6 = arith.constant 0 : index
    %c0_7 = arith.constant 0 : index
    %9 = vector.load %arg4[%c0_6, %c0_7] : memref<128x128xbf16, #tpu.memory_space<vmem>>, vector<128x128xbf16>
    %cst_8 = arith.constant dense<0.000000e+00> : vector<8x128xf32>
    %10 = tpu.matmul %8, %9, %cst_8 {dimension_numbers = #tpu.dot_dimension_numbers<[1], [0], [0], [1], [0, 0, 1, 1], [], []>} : vector<8x128xbf16>, vector<128x128xbf16>, vector<8x128xf32> -> vector<8x128xf32>
    %c0_9 = arith.constant 0 : index
    %c0_10 = arith.constant 0 : index
    %11 = vector.load %arg5[%c0_9, %c0_10] : memref<1x128xf32, #tpu.memory_space<vmem>>, vector<1x128xf32>
    %12 = vector.broadcast %11 : vector<1x128xf32> to vector<8x128xf32>
    %13 = arith.addf %10, %12 : vector<8x128xf32>
    %cst_11 = arith.constant 0.000000e+00 : f32
    %14 = vector.broadcast %cst_11 : f32 to vector<8x128xf32>
    %15 = arith.maximumf %13, %14 : vector<8x128xf32>
    %c0_12 = arith.constant 0 : index
    %c0_13 = arith.constant 0 : index
    %16 = vector.load %arg6[%c0_12, %c0_13] : memref<8x128xf32, #tpu.memory_space<vmem>>, vector<8x128xf32>
    tpu.vector_store %arg6[%c0_12, %c0_13], %15 {strides = array<i32>} : memref<8x128xf32, #tpu.memory_space<vmem>>, vector<8x128xf32>,
    return
  }
  func.func @transform_0(%arg0: i32) -> (i32, i32) {
    %c0_i32 = arith.constant 0 : i32
    %c0_i32_0 = arith.constant 0 : i32
    return %arg0, %c0_i32 : i32, i32
  }
  func.func @transform_1(%arg0: i32) -> (i32, i32) {
    %c0_i32 = arith.constant 0 : i32
    %c0_i32_0 = arith.constant 0 : i32
    %c0_i32_1 = arith.constant 0 : i32
    return %c0_i32, %c0_i32_0 : i32, i32
  }
  func.func @transform_2(%arg0: i32) -> (i32, i32) {
    %c0_i32 = arith.constant 0 : i32
    %c0_i32_0 = arith.constant 0 : i32
    %c0_i32_1 = arith.constant 0 : i32
    return %c0_i32, %c0_i32_0 : i32, i32
  }
  func.func @transform_3(%arg0: i32) -> (i32, i32) {
    %c0_i32 = arith.constant 0 : i32
    %c0_i32_0 = arith.constant 0 : i32
    %c0_i32_1 = arith.constant 0 : i32
    return %c0_i32, %c0_i32_0 : i32, i32
  }
  func.func @transform_4(%arg0: i32) -> (i32, i32) {
    %c0_i32 = arith.constant 0 : i32
    %c0_i32_0 = arith.constant 0 : i32
    %c0_i32_1 = arith.constant 0 : i32
    return %c0_i32, %c0_i32_0 : i32, i32
  }
  func.func @transform_5(%arg0: i32) -> (i32, i32) {
    %c0_i32 = arith.constant 0 : i32
    %c0_i32_0 = arith.constant 0 : i32
    return %arg0, %c0_i32 : i32, i32
  }
}

</mosaic_0001>

<bundles_post_ra>
// kernel: tpu_custom_call.1
= control target key start
LH: loop header
LB: loop body
LE: loop exit
PB: predicated region body
PF: predicated region fallthrough
CT: control target
= control target key end

     0   :  { %10 = vsyncpa [#allocation3], 0  ;;  %s1324_s0 = inlined_call_operand.hbm [shape: bf16[8,896], index: 0, kind: input, shape index: {}]   ;;  %s1325_s1 = inlined_call_operand.hbm [shape: bf16[896,128], index: 1, kind: input, shape index: {}]   ;;  %s1326_s2 = inlined_call_operand.vmem [shape: f32[1,128], index: 2, kind: input, shape index: {}]   ;;  %s1327_s3 = inlined_call_operand.hbm [shape: bf16[128,128], index: 3, kind: input, shape index: {}]   ;;  %s1328_s4 = inlined_call_operand.vmem [shape: f32[1,128], index: 4, kind: input, shape index: {}]   ;;  %s1329_s5 = inlined_call_operand.hbm [shape: f32[8,128], index: 5, kind: output, shape index: {}]  }
   0x1   :  { %11 = vsyncpa [#allocation6], 0 }
   0x2   :  { %12 = vsyncpa [#allocation4], 0  ;;  %s1206_s18 = smov [#allocation5]   ;;  %s1112_s22 = scalar_lea.hbm %s1325_s1, 7168 }
   0x3   :  { %s28_s19 = sshll.u32 %s1206_s18, 4  ;;  %p1113_p0 = scmp.ne.s32.totalorder %s1325_s1, %s1112_s22  ;;  %s29_s19 = int_to_ptr.vmem [resolvable:$true] %s28_s19 }
   0x4   :  { %p1116_p1 = scmp.lt.u32.totalorder %s1112_s22, %s1325_s1 }
   0x6   :  { %p1118_p2 = pnand %p1116_p1, %p1113_p0 }
   0x8   :  { %1121 = shalt.err (!%p1118_p2)
}
   0x9   :  { %s1122_s27 = scalar_lea.vmem %s29_s19, 7168  ;;  %p1127_p4 = scmp.lt.s32.totalorder %s29_s19, %s29_s19 }
   0xa   :  { %p1123_p3 = scmp.ne.s32.totalorder %s29_s19, %s1122_s27  ;;  %p1128_p5 = scmp.lt.s32.totalorder %s1122_s27, %s1122_s27 }
   0xc   :  { %p1129_p6 = por %p1128_p5, %p1127_p4 }
   0xe   :  { %p1130_p7 = pnand %p1129_p6, %p1123_p3 }
  0x10   :  { %1133 = shalt.err (!%p1130_p7)
}
  0x11   :  { %s1207_s28 = smov 64   ;;  %s1208_s29 = smov 4  }
  0x12   :  { %34 = dma.hbm_to_vmem [thread:$0]  %s1325_s1, 7168, %s29_s19, [#allocation6], %s1207_s28, %s1207_s28, %s1208_s29  }
  0x13   :  { %s1209_s7 = smov [#allocation2]   ;;  %s1210_s9 = smov [#allocation7]  }
  0x14   :  { %s19_s8 = sshll.u32 %s1209_s7, 4  ;;  %s42_s10 = sshll.u32 %s1210_s9, 4  ;;  %s20_s8 = int_to_ptr.vmem [resolvable:$true] %s19_s8  ;;  %s43_s10 = int_to_ptr.vmem [resolvable:$true] %s42_s10 }
  0x15   :  { %s1134_s13 = scalar_lea.hbm %s1324_s0, 448 }
  0x16   :  { %p1135_p8 = scmp.ne.s32.totalorder %s1324_s0, %s1134_s13  ;;  %p1138_p9 = scmp.lt.u32.totalorder %s1134_s13, %s1324_s0 }
  0x18   :  { %p1140_p10 = pnand %p1138_p9, %p1135_p8 }
  0x1a   :  { %1143 = shalt.err (!%p1140_p10)
}
  0x1b   :  { %s1144_s1 = scalar_lea.vmem %s20_s8, 448  ;;  %p1149_p12 = scmp.lt.s32.totalorder %s20_s8, %s20_s8 }
  0x1c   :  { %p1145_p11 = scmp.ne.s32.totalorder %s20_s8, %s1144_s1  ;;  %p1150_p13 = scmp.lt.s32.totalorder %s1144_s1, %s1144_s1 }
  0x1e   :  { %p1151_p0 = por %p1150_p13, %p1149_p12 }
  0x20   :  { %p1152_p1 = pnand %p1151_p0, %p1145_p11 }
  0x22   :  { %1155 = shalt.err (!%p1152_p1)
}
  0x23   :  { %22 = dma.hbm_to_vmem [thread:$0]  %s1324_s0, 448, %s20_s8, [#allocation3]  }
  0x24   :  { %s1156_s22 = scalar_lea.hbm %s1327_s3, 1024 }
  0x25   :  { %p1157_p2 = scmp.ne.s32.totalorder %s1327_s3, %s1156_s22  ;;  %p1160_p3 = scmp.lt.u32.totalorder %s1156_s22, %s1327_s3 }
  0x27   :  { %p1162_p4 = pnand %p1160_p3, %p1157_p2 }
  0x29   :  { %1165 = shalt.err (!%p1162_p4)
}
  0x2a   :  { %s1166_s27 = scalar_lea.vmem %s43_s10, 1024  ;;  %p1171_p6 = scmp.lt.s32.totalorder %s43_s10, %s43_s10 }
  0x2b   :  { %p1167_p5 = scmp.ne.s32.totalorder %s43_s10, %s1166_s27  ;;  %p1172_p7 = scmp.lt.s32.totalorder %s1166_s27, %s1166_s27 }
  0x2d   :  { %p1173_p8 = por %p1172_p7, %p1171_p6 }
  0x2f   :  { %p1174_p9 = pnand %p1173_p8, %p1167_p5 }
  0x31   :  { %1177 = shalt.err (!%p1174_p9)
}
  0x32   :  { %48 = dma.hbm_to_vmem [thread:$0]  %s1327_s3, 1024, %s43_s10, [#allocation6], %s1207_s28, %s1207_s28, %s1208_s29  }
  0x33   :  { %1200 = dma.done.wait [#allocation3], 448  }
  0x34   :  { %1201 = vsyncadd [#allocation3], 4294966848 }
  0x35   :  { %1202 = dma.done.wait [#allocation6], 8192  }
  0x36   :  { %1203 = vsyncadd [#allocation6], 4294959104  ;;  %v1041_v0 = vld [vmem:[#allocation5 + $0x40] sm:$0xff]   ;;  %v1045_v4 = vld [vmem:[#allocation5 + $0x48] sm:$0xff]   ;;  %v1211_v42 = vmov 0.0   ;;  %vm1212_vm0 = vmmov 0  }
  0x37   :  { %v1042_v1 = vld [vmem:[#allocation5] sm:$0xff]   ;;  %909 = vmatprep.subr.bf16.mxu0 %v1041_v0  ;;  %v1046_v5 = vld [vmem:[#allocation5 + $0x8] sm:$0xff]   ;;  %v1049_v8 = vld [vmem:[#allocation5 + $0x50] sm:$0xff]   ;;  %s1213_s6 = smov [#allocation8]  }
  0x38   :  { %v1043_v2 = vld [vmem:[#allocation5 + $0xc0] sm:$0xff]   ;;  %910 = vmatpush3.bf16.msra.mxu0 %v1042_v1  ;;  %v1047_v6 = vld [vmem:[#allocation5 + $0xc8] sm:$0xff]   ;;  %v1050_v9 = vld [vmem:[#allocation5 + $0x10] sm:$0xff]   ;;  %s826_s7 = sshll.u32 %s1213_s6, 4  ;;  %s827_s7 = int_to_ptr.vmem [resolvable:$true] %s826_s7 }
  0x39   :  { %v1044_v3 = vld [vmem:[#allocation5 + $0x80] sm:$0xff]   ;;  %931 = vmatprep.subr.bf16.mxu1 %v1043_v2  ;;  %911 = vmatprep.subr.bf16.mxu0 %v1045_v4  ;;  %v1048_v7 = vld [vmem:[#allocation5 + $0x88] sm:$0xff]   ;;  %v1051_v10 = vld [vmem:[#allocation5 + $0xd0] sm:$0xff]   ;;  %s1178_s8 = scalar_lea.vmem %s827_s7, 128  ;;  %p1183_p11 = scmp.lt.s32.totalorder %s827_s7, %s827_s7 }
  0x3a   :  { %932 = vmatpush3.bf16.msra.mxu1 %v1044_v3  ;;  %v1052_v11 = vld [vmem:[#allocation5 + $0x90] sm:$0xff]   ;;  %v1053_v12 = vld [vmem:[#allocation5 + $0x58] sm:$0xff]   ;;  %v1057_v16 = vld [vmem:[#allocation5 + $0x60] sm:$0xff]   ;;  %p1179_p10 = scmp.ne.s32.totalorder %s827_s7, %s1178_s8  ;;  %p1184_p12 = scmp.lt.s32.totalorder %s1178_s8, %s1178_s8 }
  0x3b   :  { %933 = vmatprep.subr.bf16.mxu1 %v1047_v6  ;;  %v1054_v13 = vld [vmem:[#allocation5 + $0x18] sm:$0xff]   ;;  %v1058_v17 = vld [vmem:[#allocation5 + $0x20] sm:$0xff]   ;;  %v1061_v20 = vld [vmem:[#allocation5 + $0x68] sm:$0xff]  }
  0x3c   :  { %912 = vmatpush3.bf16.msra.mxu0 %v1046_v5  ;;  %v1055_v14 = vld [vmem:[#allocation5 + $0xd8] sm:$0xff]   ;;  %v1059_v18 = vld [vmem:[#allocation5 + $0xe0] sm:$0xff]   ;;  %v1062_v21 = vld [vmem:[#allocation5 + $0x28] sm:$0xff]   ;;  %p1185_p13 = por %p1184_p12, %p1183_p11 }
  0x3d   :  { %913 = vmatprep.subr.bf16.mxu0 %v1049_v8  ;;  %v1056_v15 = vld [vmem:[#allocation5 + $0x98] sm:$0xff]   ;;  %v1060_v19 = vld [vmem:[#allocation5 + $0xa0] sm:$0xff]   ;;  %v1063_v22 = vld [vmem:[#allocation5 + $0xe8] sm:$0xff]  }
  0x3e   :  { %934 = vmatpush3.bf16.msra.mxu1 %v1048_v7  ;;  %v1064_v23 = vld [vmem:[#allocation5 + $0xa8] sm:$0xff]   ;;  %v1065_v24 = vld [vmem:[#allocation5 + $0x70] sm:$0xff]   ;;  %v1069_v28 = vld [vmem:[#allocation5 + $0x78] sm:$0xff]   ;;  %p1186_p0 = pnand %p1185_p13, %p1179_p10 }
  0x3f   :  { %935 = vmatprep.subr.bf16.mxu1 %v1051_v10  ;;  %v1066_v25 = vld [vmem:[#allocation5 + $0x30] sm:$0xff]   ;;  %v1070_v29 = vld [vmem:[#allocation5 + $0x38] sm:$0xff]   ;;  %v61_v31 = vld [vmem:[#allocation2] sm:$0xff] }
  0x40   :  { %914 = vmatpush3.bf16.msra.mxu0 %v1050_v9  ;;  %v1067_v26 = vld [vmem:[#allocation5 + $0xf0] sm:$0xff]   ;;  %v1071_v30 = vld [vmem:[#allocation5 + $0xf8] sm:$0xff]   ;;  %v837_v32 = vcombine.low %v61_v31, %v61_v31  ;;  %v838_v33 = vcombine.high %v61_v31, %v61_v31  ;;  %v1075_v35 = vld [vmem:[#allocation5 + $0x140] sm:$0xff]  }
  0x41   :  { %915 = vmatprep.subr.bf16.mxu0 %v1053_v12  ;;  %v1068_v27 = vld [vmem:[#allocation5 + $0xb0] sm:$0xff]   ;;  %v1074_v34 = vld [vmem:[#allocation5 + $0xb8] sm:$0xff]   ;;  %v1078_v39 = vld [vmem:[#allocation5 + $0x100] sm:$0xff]  }
  0x42   :  { %936 = vmatpush3.bf16.msra.mxu1 %v1052_v11  ;;  %v62_v36 = vld [vmem:[#allocation2 + $0x8] sm:$0xff]  ;;  %577 = vmatprep.mubr.bf16.mxu0 %v838_v33  ;;  %v1079_v40 = vld [vmem:[#allocation5 + $0x180] sm:$0xff]   ;;  %v1086_v48 = vld [vmem:[#allocation5 + $0x158] sm:$0xff]  }
  0x43   :  { %937 = vmatprep.subr.bf16.mxu1 %v1055_v14  ;;  %v839_v37 = vcombine.low %v62_v36, %v62_v36  ;;  %v840_v38 = vcombine.high %v62_v36, %v62_v36  ;;  %v1080_v41 = vld [vmem:[#allocation5 + $0x148] sm:$0xff]   ;;  %v1083_v45 = vld [vmem:[#allocation5 + $0x150] sm:$0xff]   ;;  %v1087_v49 = vld [vmem:[#allocation5 + $0x118] sm:$0xff]  }
  0x44   :  { %916 = vmatpush3.bf16.msra.mxu0 %v1054_v13  ;;  %v1081_v43 = vld [vmem:[#allocation5 + $0x108] sm:$0xff]   ;;  %v1084_v46 = vld [vmem:[#allocation5 + $0x110] sm:$0xff]   ;;  %v1089_v50 = vld [vmem:[#allocation5 + $0x160] sm:$0xff]  }
  0x45   :  { %917 = vmatprep.subr.bf16.mxu0 %v1057_v16  ;;  %617 = vmatprep.mubr.bf16.mxu1 %v840_v38  ;;  %v1082_v44 = vld [vmem:[#allocation5 + $0x188] sm:$0xff]   ;;  %v1085_v47 = vld [vmem:[#allocation5 + $0x190] sm:$0xff]   ;;  %v1088_v51 = vld [vmem:[#allocation5 + $0x198] sm:$0xff]  }
  0x46   :  { %938 = vmatpush3.bf16.msra.mxu1 %v1056_v15  ;;  %v1090_v52 = vld [vmem:[#allocation5 + $0x120] sm:$0xff]   ;;  %v1092_v53 = vld [vmem:[#allocation5 + $0x168] sm:$0xff]   ;;  %v1095_v56 = vld [vmem:[#allocation5 + $0x170] sm:$0xff]  }
  0x47   :  { %939 = vmatprep.subr.bf16.mxu1 %v1059_v18  ;;  %v1091_v54 = vld [vmem:[#allocation5 + $0x1a0] sm:$0xff]   ;;  %v1093_v55 = vld [vmem:[#allocation5 + $0x128] sm:$0xff]   ;;  %v1096_v58 = vld [vmem:[#allocation5 + $0x130] sm:$0xff]  }
  0x48   :  { %918 = vmatpush3.bf16.msra.mxu0 %v1058_v17  ;;  %v1094_v57 = vld [vmem:[#allocation5 + $0x1a8] sm:$0xff]   ;;  %v63_v59 = vld [vmem:[#allocation2 + $0x10] sm:$0xff]  ;;  %v1103_v2 = vld [vmem:[#allocation2 + $0x18] ss:$0 sps:$4 sm:$0xff]  }
  0x49   :  { %919 = vmatprep.subr.bf16.mxu0 %v1061_v20  ;;  %v1097_v60 = vld [vmem:[#allocation5 + $0x1b0] sm:$0xff]   ;;  %v842_v61 = vcombine.high %v63_v59, %v63_v59  ;;  %v1098_v62 = vld [vmem:[#allocation5 + $0x178] sm:$0xff]   ;;  %v841_v1 = vcombine.low %v63_v59, %v63_v59  ;;  %v1104_v3 = vld [vmem:[#allocation7] sm:$0xff]  }
  0x4a   :  { %940 = vmatpush3.bf16.msra.mxu1 %v1060_v19  ;;  %v1099_v63 = vld [vmem:[#allocation5 + $0x138] sm:$0xff]   ;;  %v1105_v4 = vld [vmem:[#allocation7 + $0x8] sm:$0xff]   ;;  %v1106_v5 = vld [vmem:[#allocation7 + $0x10] sm:$0xff]  }
  0x4b   :  { %941 = vmatprep.subr.bf16.mxu1 %v1063_v22  ;;  %v1102_v0 = vld [vmem:[#allocation5 + $0x1b8] sm:$0xff]   ;;  %v1108_v7 = vld [vmem:[#allocation7 + $0x20] sm:$0xff]   ;;  %v1109_v8 = vld [vmem:[#allocation7 + $0x28] sm:$0xff]  }
  0x4c   :  { %920 = vmatpush3.bf16.msra.mxu0 %v1062_v21  ;;  %v1107_v6 = vld [vmem:[#allocation7 + $0x18] sm:$0xff]   ;;  %v1110_v9 = vld [vmem:[#allocation7 + $0x30] sm:$0xff]   ;;  %v836_v12 = vld [vmem:[%s1326_s2] ss:$0 sm:$0xff] }
  0x4d   :  { %921 = vmatprep.subr.bf16.mxu0 %v1065_v24  ;;  %v1111_v10 = vld [vmem:[#allocation7 + $0x38] sm:$0xff]  }
  0x4e   :  { %942 = vmatpush3.bf16.msra.mxu1 %v1064_v23 }
  0x4f   :  { %943 = vmatprep.subr.bf16.mxu1 %v1067_v26 }
  0x50   :  { %922 = vmatpush3.bf16.msra.mxu0 %v1066_v25 }
  0x51   :  { %923 = vmatprep.subr.bf16.mxu0 %v1069_v28 }
  0x52   :  { %944 = vmatpush3.bf16.msra.mxu1 %v1068_v27 }
  0x53   :  { %945 = vmatprep.subr.bf16.mxu1 %v1071_v30 }
  0x54   :  { %924 = vmatpush3.bf16.msra.mxu0 %v1070_v29 }
  0x55   :  { %953 = vmatprep.subr.bf16.mxu0 %v1075_v35 }
  0x56   :  { %946 = vmatpush3.bf16.msra.mxu1 %v1074_v34 }
  0x57   :  { %578 = vmatmul.mubr.bf16.vlgmr.msra.gmra.mrb[0].mxu0 %v837_v32  ;;  %993 = vmatprep.subr.bf16.mxu1 %v1211_v42 }
  0x58   :  { %954 = vmatpush3.bf16.msra.mxu0 %v1078_v39  ;;  %657 = vmatprep.mubr.bf16.mxu0 %v842_v61 }
  0x59   :  { %618 = vmatmul.mubr.bf16.vlgmr.msra.gmra.mrb[0].mxu1 %v839_v37  ;;  %955 = vmatprep.subr.bf16.mxu0 %v1080_v41  ;;  %v900_v37 = vld [vmem:[%s1328_s4] ss:$0 sm:$0xff] }
  0x5a   :  { %994 = vmatpush3.bf16.msra.mxu1 %v1079_v40  ;;  %1009 = vmatprep.mubr.msk.bf16.mxu1 %vm1212_vm0, %v1211_v42 }
  0x5b   :  { %995 = vmatprep.subr.bf16.mxu1 %v1211_v42 }
  0x5c   :  { %956 = vmatpush3.bf16.msra.mxu0 %v1081_v43 }
  0x5d   :  { %957 = vmatprep.subr.bf16.mxu0 %v1083_v45 }
  0x5e   :  { %996 = vmatpush3.bf16.msra.mxu1 %v1082_v44 }
  0x5f   :  { %997 = vmatprep.subr.bf16.mxu1 %v1211_v42 }
  0x60   :  { %958 = vmatpush3.bf16.msra.mxu0 %v1084_v46 }
  0x61   :  { %959 = vmatprep.subr.bf16.mxu0 %v1086_v48 }
  0x62   :  { %998 = vmatpush3.bf16.msra.mxu1 %v1085_v47 }
  0x63   :  { %999 = vmatprep.subr.bf16.mxu1 %v1211_v42 }
  0x64   :  { %960 = vmatpush3.bf16.msra.mxu0 %v1087_v49 }
  0x65   :  { %961 = vmatprep.subr.bf16.mxu0 %v1089_v50 }
  0x66   :  { %1000 = vmatpush3.bf16.msra.mxu1 %v1088_v51 }
  0x67   :  { %1001 = vmatprep.subr.bf16.mxu1 %v1211_v42 }
  0x68   :  { %962 = vmatpush3.bf16.msra.mxu0 %v1090_v52 }
  0x69   :  { %963 = vmatprep.subr.bf16.mxu0 %v1092_v53 }
  0x6a   :  { %1002 = vmatpush3.bf16.msra.mxu1 %v1091_v54 }
  0x6b   :  { %1003 = vmatprep.subr.bf16.mxu1 %v1211_v42 }
  0x6c   :  { %964 = vmatpush3.bf16.msra.mxu0 %v1093_v55 }
  0x6d   :  { %965 = vmatprep.subr.bf16.mxu0 %v1095_v56 }
  0x6e   :  { %1004 = vmatpush3.bf16.msra.mxu1 %v1094_v57 }
  0x6f   :  { %1005 = vmatprep.subr.bf16.mxu1 %v1211_v42 }
  0x70   :  { %966 = vmatpush3.bf16.msra.mxu0 %v1096_v58 }
  0x71   :  { %967 = vmatprep.subr.bf16.mxu0 %v1098_v62 }
  0x72   :  { %1006 = vmatpush3.bf16.msra.mxu1 %v1097_v60 }
  0x73   :  { %1007 = vmatprep.subr.bf16.mxu1 %v1211_v42 }
  0x74   :  { %968 = vmatpush3.bf16.msra.mxu0 %v1099_v63 }
  0x75   :  { %1013 = vmatprep.subr.bf16.mxu0 %v1211_v42 }
  0x76   :  { %1008 = vmatpush3.bf16.msra.mxu1 %v1102_v0 }
  0x77   :  { %658 = vmatmul.mubr.bf16.vlgmr.msra.gmra.mrb[4].mxu0 %v841_v1 }
  0x78   :  { %1029 = vmatprep.mubr.msk.bf16.mxu0 %vm1212_vm0, %v1211_v42  ;;  %1014 = vmatpush3.bf16.msra.mxu0 %v1104_v3 }
  0x79   :  { %1010 = vmatmul.mubr.bf16.vlgmr.msra.gmra.mrb[4].mxu1 %v1103_v2  ;;  %1015 = vmatprep.subr.bf16.mxu0 %v1211_v42 }
  0x7c   :  { %1016 = vmatpush3.bf16.msra.mxu0 %v1105_v4 }
  0x7d   :  { %1017 = vmatprep.subr.bf16.mxu0 %v1211_v42 }
  0x80   :  { %1018 = vmatpush3.bf16.msra.mxu0 %v1106_v5 }
  0x81   :  { %1019 = vmatprep.subr.bf16.mxu0 %v1211_v42 }
  0x84   :  { %1020 = vmatpush3.bf16.msra.mxu0 %v1107_v6 }
  0x85   :  { %1021 = vmatprep.subr.bf16.mxu0 %v1211_v42 }
  0x88   :  { %1022 = vmatpush3.bf16.msra.mxu0 %v1108_v7 }
  0x89   :  { %1023 = vmatprep.subr.bf16.mxu0 %v1211_v42 }
  0x8c   :  { %1024 = vmatpush3.bf16.msra.mxu0 %v1109_v8 }
  0x8d   :  { %1025 = vmatprep.subr.bf16.mxu0 %v1211_v42 }
  0x90   :  { %1026 = vmatpush3.bf16.msra.mxu0 %v1110_v9 }
  0x91   :  { %1027 = vmatprep.subr.bf16.mxu0 %v1211_v42 }
  0x94   :  { %1028 = vmatpush3.bf16.msra.mxu0 %v1111_v10 }
 0x12a   :  { %v925_v11 = vpop.f32.mrb[0].mxu0 }
 0x12b   :  { %v926_v13 = vpop.f32.mrb[1].mxu0 }
 0x12c   :  { %v927_v14 = vadd.f32 %v926_v13, %v925_v11  ;;  %v928_v15 = vpop.f32.mrb[2].mxu0  ;;  %v947_v16 = vpop.f32.mrb[0].mxu1 }
 0x12d   :  { %v929_v17 = vpop.f32.mrb[3].mxu0  ;;  %v948_v18 = vpop.f32.mrb[1].mxu1 }
 0x12e   :  { %v580_v19 = vadd.f32 %v927_v14, %v836_v12  ;;  %v949_v20 = vadd.f32 %v948_v18, %v947_v16  ;;  %v950_v21 = vpop.f32.mrb[2].mxu1 }
 0x12f   :  { %v951_v22 = vpop.f32.mrb[3].mxu1 }
 0x130   :  { %v620_v23 = vadd.f32 %v949_v20, %v580_v19 }
 0x14a   :  { %v969_v24 = vpop.f32.mrb[4].mxu0 }
 0x14b   :  { %v970_v25 = vpop.f32.mrb[5].mxu0 }
 0x14c   :  { %v971_v26 = vadd.f32 %v970_v25, %v969_v24  ;;  %v972_v27 = vpop.f32.mrb[6].mxu0  ;;  %v699_v28 = vpop.f32.mrb[4].mxu1 }
 0x14d   :  { %v973_v29 = vpop.f32.mrb[7].mxu0  ;;  %v1011_v30 = vpop.f32.mrb[5].mxu1 }
 0x14e   :  { %v660_v31 = vadd.f32 %v971_v26, %v620_v23  ;;  %v702_v32 = vpop.f32.mrb[6].mxu1 }
 0x14f   :  { %v1012_v33 = vpop.f32.mrb[7].mxu1 }
 0x150   :  { %v700_v34 = vadd.f32 %v699_v28, %v660_v31 }
 0x152   :  { %v705_v35 = vmax.f32 %v700_v34, 0.0 }
 0x154   :  { %v706_v36 = vpack.c.bf16 %v705_v35, %v705_v35 }
 0x156   :  { %1030 = vmatmul.mubr.bf16.vlgmr.msra.gmra.mrb[8].mxu0 %v706_v36 }
 0x229   :  { %v812_v38 = vpop.f32.mrb[8].mxu0 }
 0x22a   :  { %v813_v39 = vadd.f32 %v900_v37, %v812_v38  ;;  %v1031_v40 = vpop.f32.mrb[9].mxu0 }
 0x22b   :  { %v815_v41 = vpop.f32.mrb[10].mxu0 }
 0x22c   :  { %v818_v42 = vmax.f32 %v813_v39, 0.0  ;;  %v1032_v43 = vpop.f32.mrb[11].mxu0 }
 0x22e   :  { %819 = vst [vmem:[#allocation8] sm:$0xff] %v818_v42 }
 0x22f   :  { %1189 = shalt.err (!%p1186_p0)
}
 0x230   :  { %s1190_s4 = scalar_lea.hbm %s1329_s5, 128 }
 0x231   :  { %p1191_p1 = scmp.ne.s32.totalorder %s1329_s5, %s1190_s4  ;;  %p1194_p2 = scmp.lt.u32.totalorder %s1190_s4, %s1329_s5 }
 0x233   :  { %p1196_p3 = pnand %p1194_p2, %p1191_p1 }
 0x235   :  { %1199 = shalt.err (!%p1196_p3)
}
 0x236   :  { %829 = dma.vmem_to_hbm [thread:$0]  %s827_s7, 128, %s1329_s5, [#allocation4]  }
 0x237   :  { %1204 = dma.done.wait [#allocation4], 128  }
 0x238   :  { %1205 = vsyncadd [#allocation4], 4294967168 }
 0x239   :  { %833 = vsyncpa [#allocation3], 1 }
 0x23a   :  { %834 = vsyncpa [#allocation6], 1 }
 0x23b   :  { %835 = vsyncpa [#allocation4], 1 }

</bundles_post_ra>
